<compile_context>
chip_gen: v7x
topology: tpu7x:2x2x1
jax: 0.10.0
libtpu: 0.0.40
codegen_flags: <defaults>
</compile_context>

<pallas_src>
import functools

import jax
import jax.numpy as jnp
from jax.experimental import pallas as pl
from jax.experimental.pallas import tpu as pltpu


def _conv_bwd_kernel(go_ref, x_ref, w2t_ref, gi_ref, gwp_ref, *, spatial_w):
    """One (image, row-tile) step.

    go_ref : [1, 1, Cout, THW + 2*HP]  halo'd flattened grad_out (channel-major)
    x_ref  : [1, Cin, THW]             input pixels, native NCHW slab
    w2t_ref: [Cin, 9*Cout]             weight, column (kh*3+kw)*Cout+co == w[co,ci,kh,kw]
    gi_ref : [1, Cin, THW]             grad_input tile (channel-major, lane-dense)
    gwp_ref: [1, 1, Cin, 9*Cout]       grad_weight partial for this tile
    """
    cout = go_ref.shape[2]
    thw = x_ref.shape[2]
    hp = (go_ref.shape[3] - thw) // 2          # halo width (static)

    # w-coordinate of every output pixel in this tile (THW is a multiple of W),
    # used to mask the row-wrap of the flattened-shift trick.
    lane_w = jax.lax.broadcasted_iota(jnp.int32, (cout, thw), 1) % spatial_w
    keep_r = lane_w != (spatial_w - 1)         # kw == 0 taps: source col w+1 invalid at w=W-1
    keep_l = lane_w != 0                       # kw == 2 taps: source col w-1 invalid at w=0

    # Build the nine shifted grad_out taps in VMEM (static, cheap slices of a tiny
    # Cout=4-row buffer).  tap(kh,kw)[co, m] = grad_out[co, h+1-kh, w+1-kw] (0 if OOB),
    # which along the flattened spatial axis is a shift by (1-kh)*W + (1-kw); the
    # h-overflow lands in the zero halo, the w-wrap is masked explicitly.
    taps = []
    for kh in range(3):
        for kw in range(3):
            shift = (1 - kh) * spatial_w + (1 - kw)
            tap = go_ref[0, 0, :, pl.ds(hp + shift, thw)]      # [Cout, THW]
            if kw == 0:
                tap = jnp.where(keep_r, tap, 0.0)
            elif kw == 2:
                tap = jnp.where(keep_l, tap, 0.0)
            taps.append(tap)
    gocol_t = jnp.concatenate(taps, axis=0)                    # [9*Cout, THW]

    # grad_input tile, channel-major -> lane-dense store over THW (multiple of 128).
    # All nine taps folded into one K = 9*Cout contraction.
    gi_ref[0] = jnp.dot(w2t_ref[...], gocol_t,
                        preferred_element_type=jnp.float32)    # [Cin, THW]

    # grad_weight partial for this tile: contract the THW pixels once
    # (x block streams through the MXU exactly once per tile).
    gwp_ref[0, 0] = jax.lax.dot_general(
        x_ref[0], gocol_t,
        dimension_numbers=(((1,), (1,)), ((), ())),
        preferred_element_type=jnp.float32)                    # [Cin, 9*Cout]


def _pick_row_tile(n, h, w, cin, target_pixels=4096, vmem_budget=20 * 1024 * 1024):
    """Pick TH (image rows per tile): TH | H, TH*W lane-dense (mult of 128) or the
    whole image, ~target_pixels per tile under a VMEM budget, and >= 2 grid steps
    total when possible (megacore / pipelining)."""
    max_thw = max(128, vmem_budget // (16 * max(cin, 1)))      # double-buffered x+gi
    target = min(target_pixels, max_thw)
    cands = [th for th in range(1, h + 1)
             if h % th == 0 and ((th * w) % 128 == 0 or th == h)]
    fitting = [th for th in cands if th * w <= target]
    multi = [th for th in fitting if n * (h // th) >= 2]
    if multi:
        return max(multi)
    if fitting:
        return max(fitting)
    return min(cands)


@functools.partial(jax.jit, static_argnames=("tile_rows",))
def conv2d_backward(grad_out, x, w, tile_rows=None):
    """grad_out: [N,Cout,H,W], x: [N,Cin,H,W], w: [Cout,Cin,3,3]  (stride=1, pad=1)."""
    N, Cout, H, W = grad_out.shape
    _, Cin, _, _ = x.shape
    K = 3
    assert w.shape == (Cout, Cin, K, K)
    assert x.shape == (N, Cin, H, W)
    KC = K * K * Cout                                          # 9*Cout

    TH = _pick_row_tile(N, H, W, Cin) if tile_rows is None else int(tile_rows)
    assert H % TH == 0, (H, TH)
    THW = TH * W
    assert THW % 128 == 0 or TH == H, (TH, W)
    T_h = H // TH
    HP = W + 1                                                 # halo >= W+1 pixels
    L = THW + 2 * HP

    # ------------- XLA glue: layout only, and only on the tiny tensors ------------
    # x / grad_input stay in native NCHW; these reshapes are contiguous-dim merges
    # (no HBM transpose pass).
    x3 = x.reshape(N, Cin, H * W)

    # Per-row-tile halo windows of the flattened grad_out (channel-major).  This is
    # ~1x grad_out (Cout=4 lanes) plus small halos -- NOT a 9x im2col.
    g_flat = grad_out.reshape(N, Cout, H * W)
    g_pad = jnp.pad(g_flat, ((0, 0), (0, 0), (HP, HP)))
    go_halo = jnp.stack([g_pad[:, :, t * THW: t * THW + L] for t in range(T_h)],
                        axis=1)                                # [N, T_h, Cout, L]

    # weight -> [Cin, 9*Cout]; column (kh*3+kw)*Cout + co == w[co, ci, kh, kw].
    w2t = jnp.transpose(w, (1, 2, 3, 0)).reshape(Cin, KC)

    flops = 4 * N * H * W * KC * Cin                           # two matmuls, 2 flop/MAC
    bytes_accessed = 4 * (2 * N * H * W * Cin + N * T_h * Cout * L
                          + Cin * KC + N * T_h * Cin * KC)
    cost = pl.CostEstimate(flops=flops, transcendentals=0,
                           bytes_accessed=bytes_accessed)

    kernel = functools.partial(_conv_bwd_kernel, spatial_w=W)

    gi3, gw_part = pl.pallas_call(
        kernel,
        grid=(N, T_h),
        in_specs=[
            pl.BlockSpec((1, 1, Cout, L), lambda n, t: (n, t, 0, 0)),   # grad_out halo tile
            pl.BlockSpec((1, Cin, THW), lambda n, t: (n, 0, t)),        # x tile (read once)
            pl.BlockSpec((Cin, KC), lambda n, t: (0, 0)),               # reshaped weight
        ],
        out_specs=[
            pl.BlockSpec((1, Cin, THW), lambda n, t: (n, 0, t)),        # grad_input tile
            pl.BlockSpec((1, 1, Cin, KC), lambda n, t: (n, t, 0, 0)),   # grad_weight partial
        ],
        out_shape=(
            jax.ShapeDtypeStruct((N, Cin, H * W), jnp.float32),
            jax.ShapeDtypeStruct((N, T_h, Cin, KC), jnp.float32),
        ),
        compiler_params=pltpu.CompilerParams(
            dimension_semantics=("parallel", "parallel"),
            vmem_limit_bytes=32 * 1024 * 1024),
        cost_estimate=cost,
    )(go_halo, x3, w2t)

    grad_input = gi3.reshape(N, Cin, H, W)                              # NCHW, no transpose
    grad_weight = jnp.sum(gw_part, axis=(0, 1)).reshape(Cin, K, K, Cout) \
                     .transpose(3, 0, 1, 2)                             # OIHW
    grad_bias = jnp.sum(grad_out, axis=(0, 2, 3))                       # tiny; XLA (per review)
    return grad_input, grad_weight, grad_bias


def _reference_backward(grad_out, x, w):
    """Pure-JAX reference via VJP of the forward conv + bias."""
    def fwd(x_, w_, b_):
        y = jax.lax.conv_general_dilated(
            x_, w_, window_strides=(1, 1), padding=((1, 1), (1, 1)),
            dimension_numbers=("NCHW", "OIHW", "NCHW"))
        return y + b_[None, :, None, None]

    b0 = jnp.zeros((w.shape[0],), jnp.float32)
    _, vjp = jax.vjp(fwd, x, w, b0)
    return vjp(grad_out)


if __name__ == "__main__":
    # Small shapes consistent with the module (N, Cout, Cin, H, W, K=3, stride=1, pad=1).
    N, Cout, Cin, H, W = 2, 4, 32, 16, 16
    key = jax.random.PRNGKey(0)
    k1, k2, k3 = jax.random.split(key, 3)
    grad_out = jax.random.normal(k1, (N, Cout, H, W), jnp.float32)
    x = jax.random.normal(k2, (N, Cin, H, W), jnp.float32)
    w = jax.random.normal(k3, (Cout, Cin, 3, 3), jnp.float32)

    # tile_rows=8 -> grid (2, 2): exercises multi-tile halos (real neighbour rows in
    # the halo) and the per-tile grad_weight partial reduction.
    gi, gw, gb = jax.block_until_ready(conv2d_backward(grad_out, x, w, tile_rows=8))

    gi_ref, gw_ref, gb_ref = _reference_backward(grad_out, x, w)
    assert gi.shape == (N, Cin, H, W) and gw.shape == (Cout, Cin, 3, 3) and gb.shape == (Cout,)
    assert jnp.allclose(gi, gi_ref, rtol=1e-4, atol=1e-4)
    assert jnp.allclose(gw, gw_ref, rtol=1e-4, atol=1e-3)
    assert jnp.allclose(gb, gb_ref, rtol=1e-4, atol=1e-4)

    print("KERNEL_OK")
</pallas_src>

<mosaic_0001>
module attributes {stable_mosaic.version = 11 : i64} {
  func.func @_conv_bwd_kernel(%arg0: i32, %arg1: i32, %arg2: memref<1x1x4x162xf32, #tpu.memory_space<vmem>>, %arg3: memref<1x32x128xf32, #tpu.memory_space<vmem>>, %arg4: memref<32x36xf32, #tpu.memory_space<vmem>>, %arg5: memref<1x32x128xf32, #tpu.memory_space<vmem>>, %arg6: memref<1x1x32x36xf32, #tpu.memory_space<vmem>>) attributes {dimension_semantics = [#tpu.dimension_semantics<parallel>, #tpu.dimension_semantics<parallel>], iteration_bounds = array<i64: 2, 2>, scalar_prefetch = 0 : i64, scratch_operands = 0 : i64, tpu.core_type = #tpu.core_type<tc>, window_params = [{transform_indices = @transform_0, window_bounds = array<i64: 1, 1, 4, 162>}, {transform_indices = @transform_1, window_bounds = array<i64: 1, 32, 128>}, {pipeline_mode = #tpu.pipeline_mode<synchronous>, transform_indices = @transform_2, window_bounds = array<i64: 32, 36>}, {transform_indices = @transform_3, window_bounds = array<i64: 1, 32, 128>}, {transform_indices = @transform_4, window_bounds = array<i64: 1, 1, 32, 36>}]} {
    %0 = tpu.iota {dimensions = array<i32: 1>} : vector<4x128xi32>
    %c16_i32 = arith.constant 16 : i32
    %c0_i32 = arith.constant 0 : i32
    %1 = arith.cmpi eq, %c16_i32, %c0_i32 : i32
    %c1_i32 = arith.constant 1 : i32
    %2 = arith.select %1, %c1_i32, %c16_i32 : i32
    %3 = vector.broadcast %2 : i32 to vector<4x128xi32>
    %4 = arith.remsi %0, %3 : vector<4x128xi32>
    %c0_i32_0 = arith.constant 0 : i32
    %5 = vector.broadcast %c0_i32_0 : i32 to vector<4x128xi32>
    %6 = arith.cmpi ne, %4, %5 : vector<4x128xi32>
    %c0_i32_1 = arith.constant 0 : i32
    %7 = vector.broadcast %c0_i32_1 : i32 to vector<4x128xi32>
    %8 = arith.cmpi slt, %4, %7 : vector<4x128xi32>
    %c0_i32_2 = arith.constant 0 : i32
    %9 = arith.cmpi slt, %2, %c0_i32_2 : i32
    %10 = vector.broadcast %9 : i1 to vector<4x128xi1>
    %11 = vector.broadcast %10 : vector<4x128xi1> to vector<4x128xi1>
    %12 = arith.xori %8, %11 : vector<4x128xi1>
    %13 = arith.andi %12, %6 : vector<4x128xi1>
    %14 = vector.broadcast %2 : i32 to vector<4x128xi32>
    %15 = arith.addi %4, %14 : vector<4x128xi32>
    %16 = arith.select %13, %15, %4 : vector<4x128xi1>, vector<4x128xi32>
    %c15_i32 = arith.constant 15 : i32
    %17 = vector.broadcast %c15_i32 : i32 to vector<4x128xi32>
    %18 = arith.cmpi ne, %16, %17 : vector<4x128xi32>
    %c0_i32_3 = arith.constant 0 : i32
    %19 = vector.broadcast %c0_i32_3 : i32 to vector<4x128xi32>
    %20 = arith.cmpi ne, %16, %19 : vector<4x128xi32>
    %c0 = arith.constant 0 : index
    %c0_4 = arith.constant 0 : index
    %c0_5 = arith.constant 0 : index
    %c34 = arith.constant 34 : index
    %21 = vector.load %arg2[%c0, %c0_4, %c0_5, %c34] : memref<1x1x4x162xf32, #tpu.memory_space<vmem>>, vector<1x1x4x128xf32>
    %22 = vector.shape_cast %21 : vector<1x1x4x128xf32> to vector<4x128xf32>
    %cst = arith.constant 0.000000e+00 : f32
    %23 = vector.broadcast %cst : f32 to vector<4x128xf32>
    %24 = arith.select %18, %22, %23 : vector<4x128xi1>, vector<4x128xf32>
    %c0_6 = arith.constant 0 : index
    %c0_7 = arith.constant 0 : index
    %c0_8 = arith.constant 0 : index
    %c33 = arith.constant 33 : index
    %25 = vector.load %arg2[%c0_6, %c0_7, %c0_8, %c33] : memref<1x1x4x162xf32, #tpu.memory_space<vmem>>, vector<1x1x4x128xf32>
    %26 = vector.shape_cast %25 : vector<1x1x4x128xf32> to vector<4x128xf32>
    %c0_9 = arith.constant 0 : index
    %c0_10 = arith.constant 0 : index
    %c0_11 = arith.constant 0 : index
    %c32 = arith.constant 32 : index
    %27 = vector.load %arg2[%c0_9, %c0_10, %c0_11, %c32] : memref<1x1x4x162xf32, #tpu.memory_space<vmem>>, vector<1x1x4x128xf32>
    %28 = vector.shape_cast %27 : vector<1x1x4x128xf32> to vector<4x128xf32>
    %cst_12 = arith.constant 0.000000e+00 : f32
    %29 = vector.broadcast %cst_12 : f32 to vector<4x128xf32>
    %30 = arith.select %20, %28, %29 : vector<4x128xi1>, vector<4x128xf32>
    %c0_13 = arith.constant 0 : index
    %c0_14 = arith.constant 0 : index
    %c0_15 = arith.constant 0 : index
    %c18 = arith.constant 18 : index
    %31 = vector.load %arg2[%c0_13, %c0_14, %c0_15, %c18] : memref<1x1x4x162xf32, #tpu.memory_space<vmem>>, vector<1x1x4x128xf32>
    %32 = vector.shape_cast %31 : vector<1x1x4x128xf32> to vector<4x128xf32>
    %cst_16 = arith.constant 0.000000e+00 : f32
    %33 = vector.broadcast %cst_16 : f32 to vector<4x128xf32>
    %34 = arith.select %18, %32, %33 : vector<4x128xi1>, vector<4x128xf32>
    %c0_17 = arith.constant 0 : index
    %c0_18 = arith.constant 0 : index
    %c0_19 = arith.constant 0 : index
    %c17 = arith.constant 17 : index
    %35 = vector.load %arg2[%c0_17, %c0_18, %c0_19, %c17] : memref<1x1x4x162xf32, #tpu.memory_space<vmem>>, vector<1x1x4x128xf32>
    %36 = vector.shape_cast %35 : vector<1x1x4x128xf32> to vector<4x128xf32>
    %c0_20 = arith.constant 0 : index
    %c0_21 = arith.constant 0 : index
    %c0_22 = arith.constant 0 : index
    %c16 = arith.constant 16 : index
    %37 = vector.load %arg2[%c0_20, %c0_21, %c0_22, %c16] : memref<1x1x4x162xf32, #tpu.memory_space<vmem>>, vector<1x1x4x128xf32>
    %38 = vector.shape_cast %37 : vector<1x1x4x128xf32> to vector<4x128xf32>
    %cst_23 = arith.constant 0.000000e+00 : f32
    %39 = vector.broadcast %cst_23 : f32 to vector<4x128xf32>
    %40 = arith.select %20, %38, %39 : vector<4x128xi1>, vector<4x128xf32>
    %c0_24 = arith.constant 0 : index
    %c0_25 = arith.constant 0 : index
    %c0_26 = arith.constant 0 : index
    %c2 = arith.constant 2 : index
    %41 = vector.load %arg2[%c0_24, %c0_25, %c0_26, %c2] : memref<1x1x4x162xf32, #tpu.memory_space<vmem>>, vector<1x1x4x128xf32>
    %42 = vector.shape_cast %41 : vector<1x1x4x128xf32> to vector<4x128xf32>
    %cst_27 = arith.constant 0.000000e+00 : f32
    %43 = vector.broadcast %cst_27 : f32 to vector<4x128xf32>
    %44 = arith.select %18, %42, %43 : vector<4x128xi1>, vector<4x128xf32>
    %c0_28 = arith.constant 0 : index
    %c0_29 = arith.constant 0 : index
    %c0_30 = arith.constant 0 : index
    %c1 = arith.constant 1 : index
    %45 = vector.load %arg2[%c0_28, %c0_29, %c0_30, %c1] : memref<1x1x4x162xf32, #tpu.memory_space<vmem>>, vector<1x1x4x128xf32>
    %46 = vector.shape_cast %45 : vector<1x1x4x128xf32> to vector<4x128xf32>
    %c0_31 = arith.constant 0 : index
    %c0_32 = arith.constant 0 : index
    %c0_33 = arith.constant 0 : index
    %c0_34 = arith.constant 0 : index
    %47 = vector.load %arg2[%c0_31, %c0_32, %c0_33, %c0_34] : memref<1x1x4x162xf32, #tpu.memory_space<vmem>>, vector<1x1x4x128xf32>
    %48 = vector.shape_cast %47 : vector<1x1x4x128xf32> to vector<4x128xf32>
    %cst_35 = arith.constant 0.000000e+00 : f32
    %49 = vector.broadcast %cst_35 : f32 to vector<4x128xf32>
    %50 = arith.select %20, %48, %49 : vector<4x128xi1>, vector<4x128xf32>
    %51 = tpu.concatenate %24, %26, %30, %34, %36, %40, %44, %46, %50 in 0 : vector<4x128xf32>, vector<4x128xf32>, vector<4x128xf32>, vector<4x128xf32>, vector<4x128xf32>, vector<4x128xf32>, vector<4x128xf32>, vector<4x128xf32>, vector<4x128xf32> -> vector<36x128xf32>
    %c0_36 = arith.constant 0 : index
    %c0_37 = arith.constant 0 : index
    %52 = vector.load %arg4[%c0_36, %c0_37] : memref<32x36xf32, #tpu.memory_space<vmem>>, vector<32x36xf32>
    %cst_38 = arith.constant dense<0.000000e+00> : vector<32x128xf32>
    %53 = tpu.matmul %52, %51, %cst_38 {dimension_numbers = #tpu.dot_dimension_numbers<[1], [0], [0], [1], [0, 0, 1, 1], [], []>} : vector<32x36xf32>, vector<36x128xf32>, vector<32x128xf32> -> vector<32x128xf32>
    %c0_39 = arith.constant 0 : index
    %c0_40 = arith.constant 0 : index
    %c0_41 = arith.constant 0 : index
    %54 = vector.load %arg5[%c0_39, %c0_40, %c0_41] : memref<1x32x128xf32, #tpu.memory_space<vmem>>, vector<1x32x128xf32>
    %55 = vector.shape_cast %54 : vector<1x32x128xf32> to vector<32x128xf32>
    %56 = vector.shape_cast %53 : vector<32x128xf32> to vector<1x32x128xf32>
    tpu.vector_store %arg5[%c0_39, %c0_40, %c0_41], %56 {strides = array<i32>} : memref<1x32x128xf32, #tpu.memory_space<vmem>>, vector<1x32x128xf32>,
    %c0_42 = arith.constant 0 : index
    %c0_43 = arith.constant 0 : index
    %c0_44 = arith.constant 0 : index
    %57 = vector.load %arg3[%c0_42, %c0_43, %c0_44] : memref<1x32x128xf32, #tpu.memory_space<vmem>>, vector<1x32x128xf32>
    %58 = vector.shape_cast %57 : vector<1x32x128xf32> to vector<32x128xf32>
    %cst_45 = arith.constant dense<0.000000e+00> : vector<32x36xf32>
    %59 = tpu.matmul %58, %51, %cst_45 {dimension_numbers = #tpu.dot_dimension_numbers<[1], [1], [0], [0], [0, 0, 1, 0], [], []>} : vector<32x128xf32>, vector<36x128xf32>, vector<32x36xf32> -> vector<32x36xf32>
    %c0_46 = arith.constant 0 : index
    %c0_47 = arith.constant 0 : index
    %c0_48 = arith.constant 0 : index
    %c0_49 = arith.constant 0 : index
    %60 = vector.load %arg6[%c0_46, %c0_47, %c0_48, %c0_49] : memref<1x1x32x36xf32, #tpu.memory_space<vmem>>, vector<1x1x32x36xf32>
    %61 = vector.shape_cast %60 : vector<1x1x32x36xf32> to vector<32x36xf32>
    %62 = vector.shape_cast %59 : vector<32x36xf32> to vector<1x1x32x36xf32>
    tpu.vector_store %arg6[%c0_46, %c0_47, %c0_48, %c0_49], %62 {strides = array<i32>} : memref<1x1x32x36xf32, #tpu.memory_space<vmem>>, vector<1x1x32x36xf32>,
    return
  }
  func.func @transform_0(%arg0: i32, %arg1: i32) -> (i32, i32, i32, i32) {
    %c0_i32 = arith.constant 0 : i32
    %c0_i32_0 = arith.constant 0 : i32
    %c0_i32_1 = arith.constant 0 : i32
    return %arg0, %arg1, %c0_i32, %c0_i32_0 : i32, i32, i32, i32
  }
  func.func @transform_1(%arg0: i32, %arg1: i32) -> (i32, i32, i32) {
    %c0_i32 = arith.constant 0 : i32
    %c0_i32_0 = arith.constant 0 : i32
    return %arg0, %c0_i32, %arg1 : i32, i32, i32
  }
  func.func @transform_2(%arg0: i32, %arg1: i32) -> (i32, i32) {
    %c0_i32 = arith.constant 0 : i32
    %c0_i32_0 = arith.constant 0 : i32
    %c0_i32_1 = arith.constant 0 : i32
    return %c0_i32, %c0_i32_0 : i32, i32
  }
  func.func @transform_3(%arg0: i32, %arg1: i32) -> (i32, i32, i32) {
    %c0_i32 = arith.constant 0 : i32
    %c0_i32_0 = arith.constant 0 : i32
    return %arg0, %c0_i32, %arg1 : i32, i32, i32
  }
  func.func @transform_4(%arg0: i32, %arg1: i32) -> (i32, i32, i32, i32) {
    %c0_i32 = arith.constant 0 : i32
    %c0_i32_0 = arith.constant 0 : i32
    %c0_i32_1 = arith.constant 0 : i32
    return %arg0, %arg1, %c0_i32, %c0_i32_0 : i32, i32, i32, i32
  }
}

</mosaic_0001>

<bundles_post_ra>
// kernel: conv2d_backward.1
= control target key start
LH: loop header
LB: loop body
LE: loop exit
PB: predicated region body
PF: predicated region fallthrough
CT: control target
= control target key end

     0   :  { %s1098_s15 = smov 0   ;;  %s1100_s16 = smov 0   ;;  %s1276_s0 = inlined_call_operand.vmem [shape: f32[2,2,4,162], index: 0, kind: input, shape index: {}]   ;;  %s1277_s1 = inlined_call_operand.vmem [shape: f32[2,32,256], index: 1, kind: input, shape index: {}]   ;;  %s1278_s2 = inlined_call_operand.vmem [shape: f32[32,36], index: 2, kind: input, shape index: {}]   ;;  %s1279_s3 = inlined_call_operand.vmem [shape: f32[2,32,256], index: 3, kind: output, shape index: {0}]   ;;  %s1280_s4 = inlined_call_operand.vmem [shape: f32[2,2,32,36], index: 4, kind: output, shape index: {1}]  }
   0x1   :  { %s1102_s17 = smov 0   ;;  %s1104_s18 = smov 0  }
   0x2   :  { %s1106_s19 = smov 0   ;;  %s1108_s20 = smov 0  }
   0x3   :  { %s1110_s21 = smov 0  }
   0x4 LB: > { %s24_s22 = sadd.s32 1, %s1055_s19  ;;  %s27_s23 = sadd.s32 1, %s1059_s20  ;;  %s1063_s21 = sphi %s1110_s21, %s15_s21   ;;  %s1059_s20 = sphi %s1108_s20, %s1291_s20   ;;  %s1055_s19 = sphi %s1106_s19, %s1290_s19   ;;  %s1051_s18 = sphi %s1104_s18, %s1289_s18   ;;  %s1047_s17 = sphi %s1102_s17, %s1288_s17   ;;  %s1043_s16 = sphi %s1100_s16, %s1287_s16   ;;  %s1039_s15 = sphi %s1098_s15, %s1286_s15  }
   0x5   : > { %p25_p0 = scmp.ge.s32.totalorder %s24_s22, 2  ;;  %s810_s24 = sadd.s32 4294967295, %s1063_s21  }
   0x6   : > { %p71_p1 = scmp.ne.s32.totalorder %s1043_s16, %s1039_s15  ;;  %p72_p2 = scmp.eq.s32.totalorder %s1063_s21, 0 }
   0x7   : > { %s1293_s22 = smov (%p25_p0, %s24_s22), 0  ;;  %s1295_s23 = smov (!%p25_p0, %s27_s23), %s1059_s20 }
   0x8   : > { %p29_p3 = scmp.ge.s32.totalorder %s1295_s23, 2  ;;  %p124_p4 = scmp.eq.s32.totalorder %s810_s24, 3 }
   0x9   : > { %s60_s25 = ssub.s32 %s1055_s19, %s1293_s22  ;;  %p73_p5 = por %p72_p2, %p71_p1 }
   0xa   : > { %s1297_s23 = smov (%p29_p3, %s1295_s23), 0  ;;  %p1146_p6 = por %p124_p4, %p71_p1 }
   0xb   : > { %s59_s27 = ssub.s32 %s1059_s20, %s1297_s23  ;;  %s64_s29 = sadd.s32 1, %s1043_s16 }
   0xc   : > { %s61_s28 = sor.u32 %s60_s25, %s59_s27  ;;  %p813_p8 = scmp.ge.s32.totalorder %s1063_s21, 4 }
   0xd   : > { %p62_p7 = scmp.eq.s32.totalorder %s61_s28, 0 }
   0xe   : > { %177 = sbr.rel (%p813_p8) target bundleno = 29 (0x1d), region = 20 }
   0xf   : > { %s1154_s30 = scalar_select %p62_p7, %s1043_s16, %s64_s29  }
  0x15   : > { %192 = sbr.rel (!%p73_p5) target bundleno = 29 (0x1d), region = 28  ;;  %s194_s5 = sand.u32 (%p73_p5), 1, %s1043_s16  }
  0x16   : > { %s815_s6 = sshll.u32 (%p73_p5), %s1059_s20, 3  ;;  %s814_s7 = sshll.u32 (%p73_p5), %s194_s5, 5 }
  0x17   : > { %s198_s8 = sadd.s32 (%p73_p5), %s1055_s19, %s815_s6  ;;  %s196_s13 = scalar_lea.vmem (%p73_p5), [#allocation2], %s814_s7 }
  0x18   : > { %s816_s9 = sshll.u32 (%p73_p5), %s198_s8, 3 }
  0x19   : > { %s200_s12 = scalar_lea.vmem (%p73_p5), %s1277_s1, %s816_s9 }
  0x1a   : > { %v234_v0 = vld [vmem:[%s200_s12] sm:$0xff] (%p73_p5)  ;;  %v236_v1 = vld [vmem:[%s200_s12 + $0x10] sm:$0xff] (%p73_p5) }
  0x1b   : > { %v238_v2 = vld [vmem:[%s200_s12 + $0x20] sm:$0xff] (%p73_p5)  ;;  %235 = vst [vmem:[%s196_s13] sm:$0xff] (%p73_p5), %v234_v0  ;;  %237 = vst [vmem:[%s196_s13 + $0x8] sm:$0xff] (%p73_p5), %v236_v1  ;;  %v240_v3 = vld [vmem:[%s200_s12 + $0x30] sm:$0xff] (%p73_p5) }
  0x1c   : > { %239 = vst [vmem:[%s196_s13 + $0x10] sm:$0xff] %v238_v2  ;;  %241 = vst [vmem:[%s196_s13 + $0x18] sm:$0xff] %v240_v3 }
  0x1d PF: > { %p817_p9 = scmp.ge.s32.totalorder %s1063_s21, 1  ;;  %p246_p10 = scmp.lt.s32.totalorder %s1063_s21, 5 }
  0x1f   : > { %p247_p11 = pnand %p817_p9, %p246_p10 }
  0x20   : > { %p295_p12 = scmp.lt.s32.totalorder (!%p247_p11), %s1051_s18, 1  ;;  %p297_p13 = scmp.lt.s32.totalorder (!%p247_p11), %s1047_s17, 1  ;;  %v407_v9 = vld [vmem:[%s1278_s2] sm:$0xff] (!%p247_p11)  ;;  %vm411_vm0 = vcmask (!%p247_p11), 293888   ;;  %v313_v11 = vlaneseq (!%p247_p11)  ;;  %vm344_vm1 = vcmask (!%p247_p11), 785408   ;;  %vm352_vm3 = vcmask (!%p247_p11), 900096  }
  0x21   : > { %250 = sbr.rel (%p247_p11) target bundleno = 418 (0x1a2), region = 66  ;;  %s1065_s8 = smov (!%p247_p11), 96   ;;  %865 = vmatprep.mubr.msk.f32.mxu0 (!%p247_p11), %vm411_vm0, %v407_v9  ;;  %vm379_vm5 = vcmask (!%p247_p11), 777216   ;;  %vm336_vm6 = vcmask (!%p247_p11), 769024   ;;  %vm402_vm7 = vcmask (!%p247_p11), 1043456   ;;  %vm368_vm8 = vcmask (!%p247_p11), 1031168  }
  0x22   : > { %s1066_s9 = smov (!%p247_p11), 110   ;;  %s1067_s10 = smov (!%p247_p11), 95   ;;  %v314_v12 = vand.u32 (!%p247_p11), 127, %v313_v11  ;;  %vm360_vm9 = vcmask (!%p247_p11), 916480   ;;  %vm399_vm10 = vcmask (!%p247_p11), 1039360   ;;  %vm389_vm11 = vcmask (!%p247_p11), 908288  }
  0x23   : > { %s1068_s11 = smov (!%p247_p11), 94   ;;  %s1069_s12 = smov (!%p247_p11), 126   ;;  %v408_v63 = vld [vmem:[%s1278_s2 + $0x8] sm:$0xff] (!%p247_p11)  ;;  %v409_v0 = vld [vmem:[%s1278_s2 + $0x10] sm:$0xff] (!%p247_p11)  ;;  %v410_v1 = vld [vmem:[%s1278_s2 + $0x18] sm:$0xff] (!%p247_p11) }
  0x24   : > { %s1070_s13 = smov (!%p247_p11), 112   ;;  %v319_v13 = vand.u32 (!%p247_p11), 15, %v314_v12 }
  0x26   : > { %vm1192_vm2 = vcmp.ne.s32.totalorder (!%p247_p11), %v319_v13, 15  ;;  %vm1196_vm4 = vcmp.ne.s32.totalorder (!%p247_p11), %v319_v13, 0 }
  0x28   : > { %s1168_s14 = scalar_select %p295_p12, %s1051_s18, 1 }
  0x29   : > { %s1171_s24 = scalar_select %p297_p13, %s1047_s17, 1 }
  0x2a   : > { %s821_s25 = sshll.u32 %s1168_s14, 2 }
  0x2b   : > { %s820_s27 = sshll.u32 %s1171_s24, 1 }
  0x2c   : > { %s301_s28 = sadd.s32 %s821_s25, %s820_s27  ;;  %s1071_s25 = smov 127  }
  0x2d   : > { %s822_s29 = sshll.u32 %s301_s28, 2  ;;  %s1072_s27 = smov 111  }
  0x2e   : > { %s1178_s7 = scalar_lea.vmem %s1276_s0, %s822_s29  ;;  %s253_s28 = sand.u32 1, %s1039_s15  }
  0x2f   : > { %v329_v4 = vld [vmem:[%s1178_s7] sm:$0xff]  ;;  %s1182_s29 = sshll.u32 %s253_s28, 5 }
  0x30   : > { %v331_v5 = vcombine.high %v329_v4, %v329_v4  ;;  %v374_v6 = vcombine.low %v329_v4, %v329_v4  ;;  %v372_v59 = vld [vmem:[%s1178_s7] sm:$0xf]  ;;  %s283_s28 = scalar_lea.vmem [#allocation3], %s1182_s29 }
  0x31   : > { %v373_v62 = vsel %vm1196_vm4, %v372_v59, 0.0 }
  0x32   : > { %v977_v7 = vpack.i.bf16 %v331_v5, %v329_v4  ;;  %v982_v8 = vpack.i.bf16 %v329_v4, %v374_v6 }
  0x34   : > { %978 = vrot.lane.b32.xlu1 %v977_v7, %s1065_s8  ;;  %968 = vrot.lane.b32.xlu0 %v977_v7, %s1066_s9  ;;  %s1189_s8 = scalar_lea.vmem [#allocation2], %s1182_s29 }
  0x35   : > { %v516_v10 = vld [vmem:[%s1189_s8] sm:$0xff]  ;;  %v517_v2 = vld [vmem:[%s1189_s8 + $0x8] sm:$0xff]  ;;  %v518_v3 = vld [vmem:[%s1189_s8 + $0x10] sm:$0xff] }
  0x36   : > { %881 = vmatprep.mubr.f32.mxu1 %v516_v10  ;;  %v519_v4 = vld [vmem:[%s1189_s8 + $0x18] sm:$0xff] }
  0x38   : > { %983 = vrot.lane.b32.xlu1 %v982_v8, %s1067_s10  ;;  %973 = vrot.lane.b32.xlu0 %v977_v7, %s1068_s11 }
  0x3c   : > { %993 = vrot.lane.b32.xlu1 %v977_v7, %s1069_s12  ;;  %988 = vrot.lane.b32.xlu0 %v977_v7, %s1070_s13  ;;  %s823_s13 = sshll.u32 %s1171_s24, 2 }
  0x40   : > { %1003 = vrot.lane.b32.xlu1 %v982_v8, %s1071_s25  ;;  %998 = vrot.lane.b32.xlu0 %v977_v7, %s1072_s27  ;;  %s824_s25 = sshll.u32 %s1168_s14, 3  ;;  %s833_s14 = sshll.u32 (%p1146_p6), %s1051_s18, 3 }
  0x41   : > { %s310_s27 = sadd.s32 %s824_s25, %s823_s13  ;;  %s626_s24 = sadd.s32 (%p1146_p6), %s1047_s17, %s833_s14 }
  0x42   : > { %s825_s5 = sshll.u32 %s310_s27, 3  ;;  %s834_s29 = sshll.u32 (%p1146_p6), %s626_s24, 3 }
  0x43   : > { %s312_s7 = scalar_lea.vmem %s1280_s4, %s825_s5  ;;  %s628_s10 = scalar_lea.vmem (%p1146_p6), %s1279_s3, %s834_s29 }
  0xa6   : > { %v979_v14 = vpop.permute.xlu1 %978  ;;  %v969_v16 = vpop.permute.xlu0 %968 }
  0xa7   : > { %v981_v17 = vunpack.i.h.bf16 %v979_v14  ;;  %v980_v18 = vunpack.i.l.bf16 %v979_v14  ;;  %v971_v19 = vunpack.i.h.bf16 %v969_v16  ;;  %v970_v20 = vunpack.i.l.bf16 %v969_v16 }
  0xa9   : > { %v353_v21 = vsel %vm352_vm3, %v970_v20, %v971_v19  ;;  %v345_v23 = vsel %vm344_vm1, %v980_v18, %v981_v17 }
  0xaa   : > { %v355_v24 = vsel %vm1192_vm2, %v353_v21, 0.0  ;;  %v984_v25 = vpop.permute.xlu1 %983  ;;  %v974_v26 = vpop.permute.xlu0 %973  ;;  %v347_v32 = vsel %vm1196_vm4, %v345_v23, 0.0 }
  0xab   : > { %v986_v27 = vunpack.i.h.bf16 %v984_v25  ;;  %v985_v28 = vunpack.i.l.bf16 %v984_v25  ;;  %v976_v29 = vunpack.i.h.bf16 %v974_v26  ;;  %v383_v30 = vrot.slane %v355_v24, 4 }
  0xac   : > { %v975_v31 = vunpack.i.l.bf16 %v974_v26 }
  0xad   : > { %v380_v33 = vsel %vm379_vm5, %v985_v28, %v986_v27  ;;  %v404_v43 = vsel %vm402_vm7, %v347_v32, %v383_v30 }
  0xae   : > { %v337_v34 = vsel %vm336_vm6, %v975_v31, %v976_v29  ;;  %v994_v35 = vpop.permute.xlu1 %993  ;;  %v989_v36 = vpop.permute.xlu0 %988 }
  0xaf   : > { %v339_v37 = vsel %vm1192_vm2, %v337_v34, 0.0  ;;  %v996_v38 = vunpack.i.h.bf16 %v994_v35  ;;  %v995_v39 = vunpack.i.l.bf16 %v994_v35  ;;  %v991_v40 = vunpack.i.h.bf16 %v989_v36 }
  0xb0   : > { %v990_v41 = vunpack.i.l.bf16 %v989_v36  ;;  %v403_v42 = vsel %vm402_vm7, %v339_v37, %v380_v33 }
  0xb1   : > { %v887_v44 = vpack.c.bf16 %v404_v43, %v403_v42  ;;  %v369_v45 = vsel %vm368_vm8, %v995_v39, %v996_v38 }
  0xb2   : > { %v361_v46 = vsel %vm360_vm9, %v990_v41, %v991_v40  ;;  %v1004_v47 = vpop.permute.xlu1 %1003  ;;  %v999_v48 = vpop.permute.xlu0 %998  ;;  %v371_v55 = vsel %vm1192_vm2, %v369_v45, 0.0 }
  0xb3   : > { %v363_v49 = vsel %vm1196_vm4, %v361_v46, 0.0  ;;  %v1006_v50 = vunpack.i.h.bf16 %v1004_v47  ;;  %v1005_v51 = vunpack.i.l.bf16 %v1004_v47  ;;  %v1001_v52 = vunpack.i.h.bf16 %v999_v48  ;;  %888 = vmatprep.subr.bf16.mxu0 %v887_v44  ;;  %896 = vmatprep.subr.bf16.mxu1 %v887_v44 }
  0xb4   : > { %v393_v53 = vrot.slane %v363_v49, 4  ;;  %v1000_v54 = vunpack.i.l.bf16 %v999_v48  ;;  %890 = vmatpush3.bf16.msra.mxu0 %v887_v44  ;;  %898 = vmatpush3.bf16.xpose.msra.mxu1 %v887_v44 }
  0xb5   : > { %v400_v56 = vsel %vm399_vm10, %v1005_v51, %v1006_v50 }
  0xb6   : > { %v406_v57 = vsel %vm402_vm7, %v371_v55, %v400_v56  ;;  %v390_v58 = vsel %vm389_vm11, %v1000_v54, %v1001_v52 }
  0xb7   : > { %v405_v60 = vsel %vm402_vm7, %v390_v58, %v393_v53 }
  0xb8   : > { %v891_v61 = vpack.c.bf16 %v406_v57, %v405_v60 }
  0xba   : > { %892 = vmatprep.subr.bf16.mxu0 %v891_v61  ;;  %900 = vmatprep.subr.bf16.mxu1 %v891_v61 }
  0xbb   : > { %894 = vmatpush3.bf16.msra.mxu0 %v891_v61 }
  0xbc   : > { %902 = vmatpush3.bf16.xpose.msra.mxu1 %v891_v61  ;;  %863 = vmatprep.subr.msk.mxu0 %vm402_vm7, %v373_v62 }
  0xbd   : > { %879 = vmatprep.subr.msk.mxu1 %vm1196_vm4, %v372_v59 }
  0xbf   : > { %864 = vmatpush3.msk.msra.mxu0 %vm402_vm7, %v373_v62 }
  0xc0   : > { %866 = vmatmul.mubr.msk.f32.vlgmr.msra.gmra.mrb[0].mxu0 %vm411_vm0, %v408_v63 }
  0xc1   : > { %868 = vmatprep.mubr.msk.f32.mxu0 %vm411_vm0, %v409_v0 }
  0xc4   : > { %880 = vmatpush3.xpose.msk.msra.mxu1 %vm1196_vm4, %v372_v59  ;;  %869 = vmatmul.mubr.msk.f32.gmra.mrb[2].mxu0 %vm411_vm0, %v410_v1 }
  0xc7   : > { %882 = vmatmul.mubr.f32.vlgmr.msra.gmra.mrb[0].mxu1 %v517_v2 }
  0xc8   : > { %884 = vmatprep.mubr.f32.mxu1 %v518_v3 }
  0xcb   : > { %885 = vmatmul.mubr.f32.gmra.mrb[2].mxu1 %v519_v4 }
 0x193   : > { %v867_v5 = vpop.f32.mrb[0].mxu0 }
 0x194   : > { %513 = vst [vmem:[%s283_s28 + $0x8] sm:$0xff] %v867_v5  ;;  %v493_v6 = vpop.f32.mrb[1].mxu0 }
 0x195   : > { %512 = vst [vmem:[%s283_s28] sm:$0xff] %v493_v6 }
 0x197   : > { %v870_v7 = vpop.f32.mrb[2].mxu0 }
 0x198   : > { %515 = vst [vmem:[%s283_s28 + $0x18] sm:$0xff] %v870_v7  ;;  %v503_v8 = vpop.f32.mrb[3].mxu0 }
 0x199   : > { %514 = vst [vmem:[%s283_s28 + $0x10] sm:$0xff] %v503_v8 }
 0x19a   : > { %v883_v9 = vpop.f32.mrb[0].mxu1  ;;  %624 = sbr.rel (!%p1146_p6) target bundleno = 418 (0x1a2), region = 74 }
 0x19b   : > { %606 = vst.msk [vmem:[%s312_s7 + $0x8] sm:$0xff] %vm411_vm0, %v883_v9  ;;  %v586_v10 = vpop.f32.mrb[1].mxu1  ;;  %v664_v14 = vld [vmem:[%s283_s28 + $0x8] sm:$0xff] (%p1146_p6) }
 0x19c   : > { %605 = vst.msk [vmem:[%s312_s7] sm:$0xff] %vm411_vm0, %v586_v10  ;;  %v662_v13 = vld [vmem:[%s283_s28] sm:$0xff] (%p1146_p6)  ;;  %665 = vst [vmem:[%s628_s10 + $0x10] sm:$0xff] (%p1146_p6), %v664_v14 }
 0x19d   : > { %663 = vst [vmem:[%s628_s10] sm:$0xff] (%p1146_p6), %v662_v13 }
 0x19e   : > { %v886_v11 = vpop.f32.mrb[2].mxu1 }
 0x19f   : > { %608 = vst.msk [vmem:[%s312_s7 + $0x18] sm:$0xff] %vm411_vm0, %v886_v11  ;;  %v596_v12 = vpop.f32.mrb[3].mxu1  ;;  %v668_v16 = vld [vmem:[%s283_s28 + $0x18] sm:$0xff] (%p1146_p6) }
 0x1a0   : > { %607 = vst.msk [vmem:[%s312_s7 + $0x10] sm:$0xff] %vm411_vm0, %v596_v12  ;;  %v666_v15 = vld [vmem:[%s283_s28 + $0x10] sm:$0xff] (%p1146_p6)  ;;  %669 = vst [vmem:[%s628_s10 + $0x30] sm:$0xff] (%p1146_p6), %v668_v16 }
 0x1a1   : > { %667 = vst [vmem:[%s628_s10 + $0x20] sm:$0xff] %v666_v15 }
 0x1a2 PF: > { %s15_s21 = sadd.s32 1, %s1063_s21   ;;  %s1286_s15 = smov %s1043_s16 }
 0x1a3   : > { %p12_p0 = scmp.ge.s32.totalorder %s15_s21, 6   ;;  %s1287_s16 = smov %s1154_s30 }
 0x1a4   : > { %s1288_s17 = smov %s1055_s19  ;;  %s1289_s18 = smov %s1059_s20 }
 0x1a5   : > { %s1290_s19 = smov %s1293_s22  ;;  %s1291_s20 = smov %s1297_s23 }
 0x1a6   :  { %14 = sbr.rel (!%p12_p0) target bundleno = 4 (0x4), region = 158 }

</bundles_post_ra>
